<compile_context>
chip_gen: v7x
topology: tpu7x:2x2x1
jax: 0.10.0
libtpu: 0.0.40
codegen_flags: <defaults>
</compile_context>

<pallas_src>
import functools

import jax
import jax.numpy as jnp
from jax.experimental import pallas as pl
from jax.experimental.pallas import tpu as pltpu

_LANES = 128
_SUBLANES = 8


def _masked_mse_kernel(x_ref, t_ref, m_ref, d2_out, m_out, acc_d2, acc_m):
    step = pl.program_id(1)

    @pl.when(step == 0)
    def _init():
        acc_d2[...] = jnp.zeros_like(acc_d2)
        acc_m[...] = jnp.zeros_like(acc_m)

    x = x_ref[...].astype(jnp.float32)
    t = t_ref[...].astype(jnp.float32)
    m = m_ref[...].astype(jnp.float32)

    d = x - t
    d2 = d * d * m

    # Deferred cross-lane reduction: fold the (TR, 128) tile into the (8, 128)
    # accumulators with elementwise (VPU) adds only; no XLU reduce per grid step.
    k = d2.shape[0] // _SUBLANES
    acc_d2[...] += jnp.sum(d2.reshape(k, _SUBLANES, d2.shape[1]), axis=0)
    acc_m[...] += jnp.sum(m.reshape(k, _SUBLANES, m.shape[1]), axis=0)

    @pl.when(step == pl.num_programs(1) - 1)
    def _finalize():
        d2_out[0] = acc_d2[...]
        m_out[0] = acc_m[...]


def _ceil_to(a, b):
    return -(-a // b) * b


def masked_mse_loss(inputs, target, mask, *, block_rows=2048, max_partitions=2):
    """inputs: (B, T, C); target/mask: (B, T). Returns f32 scalar (MaskedMSELoss.forward)."""
    assert block_rows > 0 and block_rows % _SUBLANES == 0
    x = inputs[:, :, 1]                      # same as PyTorch inputs[:, :, 1]
    assert x.shape == target.shape == mask.shape
    if not jnp.issubdtype(mask.dtype, jnp.floating):
        mask = mask.astype(jnp.float32)

    n = 1
    for dim in x.shape:
        n *= int(dim)

    rows = max(1, -(-n // _LANES))           # 128-lane rows needed
    rows = _ceil_to(rows, _SUBLANES)
    tr = min(block_rows, rows)               # rows per block (multiple of 8)
    n_blocks = -(-rows // tr)
    parts = max(1, min(max_partitions, n_blocks))   # leading "parallel" axis (v7x 2 TCs)
    steps = -(-n_blocks // parts)                   # reduction steps per partition
    total_rows = parts * steps * tr
    padded_n = total_rows * _LANES

    def _prep(a):
        a = a.reshape(-1)
        a = jnp.pad(a, (0, padded_n - n))    # zero pad: mask==0 there => no contribution
        return a.reshape(total_rows, _LANES)

    xp, tp, mp = _prep(x), _prep(target), _prep(mask)

    in_block = pl.BlockSpec((tr, _LANES), lambda pi, si: (pi * steps + si, 0))
    out_block = pl.BlockSpec((1, _SUBLANES, _LANES), lambda pi, si: (pi, 0, 0))

    d2_part, m_part = pl.pallas_call(
        _masked_mse_kernel,
        out_shape=(
            jax.ShapeDtypeStruct((parts, _SUBLANES, _LANES), jnp.float32),
            jax.ShapeDtypeStruct((parts, _SUBLANES, _LANES), jnp.float32),
        ),
        grid_spec=pltpu.PrefetchScalarGridSpec(
            num_scalar_prefetch=0,
            grid=(parts, steps),
            in_specs=[in_block, in_block, in_block],
            out_specs=[out_block, out_block],
            scratch_shapes=[
                pltpu.VMEM((_SUBLANES, _LANES), jnp.float32),
                pltpu.VMEM((_SUBLANES, _LANES), jnp.float32),
            ],
        ),
        compiler_params=pltpu.CompilerParams(
            dimension_semantics=("parallel", "arbitrary"),
            allow_input_fusion=[True, True, True],
        ),
    )(xp, tp, mp)

    sum_d2 = jnp.sum(d2_part)
    sum_m = jnp.sum(m_part)
    # Matches the PyTorch branch: sum(mask)==0 -> sum(diff2) (==0), else masked mean.
    return jnp.where(sum_m == 0.0, sum_d2, sum_d2 / sum_m)


def _reference(inputs, target, mask):
    x = inputs[:, :, 1].reshape(-1).astype(jnp.float32)
    t = target.reshape(-1).astype(jnp.float32)
    m = mask.reshape(-1).astype(jnp.float32)
    diff2 = (x - t) ** 2.0 * m
    s_m = jnp.sum(m)
    return jnp.where(s_m == 0.0, jnp.sum(diff2), jnp.sum(diff2) / s_m)


if __name__ == "__main__":
    key = jax.random.PRNGKey(0)
    k1, k2, k3, k4, k5, k6 = jax.random.split(key, 6)

    # --- small shapes consistent with the module's forward -------------------
    B, T, C = 2, 8, 4
    inputs = jax.random.normal(k1, (B, T, C), dtype=jnp.float32)
    target = jax.random.normal(k2, (B, T), dtype=jnp.float32)
    mask = (jax.random.uniform(k3, (B, T)) > 0.5).astype(jnp.float32)

    loss_fn = jax.jit(masked_mse_loss)

    loss = jax.block_until_ready(loss_fn(inputs, target, mask))
    ref = jax.block_until_ready(_reference(inputs, target, mask))
    assert jnp.allclose(loss, ref, rtol=1e-6, atol=1e-6), (loss, ref)

    # all-zero-mask branch (returns sum(diff2) == 0)
    zero_mask = jnp.zeros((B, T), dtype=jnp.float32)
    loss0 = jax.block_until_ready(loss_fn(inputs, target, zero_mask))
    ref0 = jax.block_until_ready(_reference(inputs, target, zero_mask))
    assert jnp.allclose(loss0, ref0, rtol=1e-6, atol=1e-6), (loss0, ref0)

    # bf16 inputs (narrower HBM traffic); kernel upcasts to f32 internally.
    loss_bf16 = jax.block_until_ready(
        loss_fn(inputs.astype(jnp.bfloat16), target.astype(jnp.bfloat16), mask))
    ref_bf16 = jax.block_until_ready(
        _reference(inputs.astype(jnp.bfloat16), target.astype(jnp.bfloat16), mask))
    assert jnp.allclose(loss_bf16, ref_bf16, rtol=1e-5, atol=1e-5), (loss_bf16, ref_bf16)

    # exercise the tiled / multi-step / multi-partition grid path + zero-padding
    B2, T2 = 8, 3000  # N=24000 -> 192 rows of 128; block_rows=64 -> parts=2, steps=2
    inputs2 = jax.random.normal(k4, (B2, T2, C), dtype=jnp.float32)
    target2 = jax.random.normal(k5, (B2, T2), dtype=jnp.float32)
    mask2 = (jax.random.uniform(k6, (B2, T2)) > 0.5).astype(jnp.float32)
    loss_fn_tiled = jax.jit(
        functools.partial(masked_mse_loss, block_rows=64, max_partitions=2))
    loss2 = jax.block_until_ready(loss_fn_tiled(inputs2, target2, mask2))
    ref2 = jax.block_until_ready(_reference(inputs2, target2, mask2))
    assert jnp.allclose(loss2, ref2, rtol=1e-5, atol=1e-5), (loss2, ref2)

    print("KERNEL_OK")
</pallas_src>

<mosaic_0001>
module attributes {stable_mosaic.version = 11 : i64} {
  func.func @_masked_mse_kernel(%arg0: i32, %arg1: i32, %arg2: memref<8x128xf32, #tpu.memory_space<vmem>>, %arg3: memref<8x128xf32, #tpu.memory_space<vmem>>, %arg4: memref<8x128xf32, #tpu.memory_space<vmem>>, %arg5: memref<1x8x128xf32, #tpu.memory_space<vmem>>, %arg6: memref<1x8x128xf32, #tpu.memory_space<vmem>>, %arg7: memref<8x128xf32, #tpu.memory_space<vmem>>, %arg8: memref<8x128xf32, #tpu.memory_space<vmem>>) attributes {dimension_semantics = [#tpu.dimension_semantics<parallel>, #tpu.dimension_semantics<arbitrary>], iteration_bounds = array<i64: 1, 1>, scalar_prefetch = 0 : i64, scratch_operands = 2 : i64, tpu.core_type = #tpu.core_type<tc>, window_params = [{transform_indices = @transform_0, window_bounds = array<i64: 8, 128>}, {transform_indices = @transform_1, window_bounds = array<i64: 8, 128>}, {transform_indices = @transform_2, window_bounds = array<i64: 8, 128>}, {transform_indices = @transform_3, window_bounds = array<i64: 1, 8, 128>}, {transform_indices = @transform_4, window_bounds = array<i64: 1, 8, 128>}]} {
    %c0_i32 = arith.constant 0 : i32
    %0 = arith.cmpi eq, %arg1, %c0_i32 : i32
    %1 = arith.extui %0 : i1 to i32
    %c0_i32_0 = arith.constant 0 : i32
    %2 = arith.cmpi ne, %1, %c0_i32_0 : i32
    scf.if %2 {
      %cst_17 = arith.constant 0.000000e+00 : f32
      %22 = vector.broadcast %cst_17 : f32 to vector<8x128xf32>
      %c0_18 = arith.constant 0 : index
      %c0_19 = arith.constant 0 : index
      %23 = vector.load %arg7[%c0_18, %c0_19] : memref<8x128xf32, #tpu.memory_space<vmem>>, vector<8x128xf32>
      tpu.vector_store %arg7[%c0_18, %c0_19], %22 {strides = array<i32>} : memref<8x128xf32, #tpu.memory_space<vmem>>, vector<8x128xf32>,
      %cst_20 = arith.constant 0.000000e+00 : f32
      %24 = vector.broadcast %cst_20 : f32 to vector<8x128xf32>
      %c0_21 = arith.constant 0 : index
      %c0_22 = arith.constant 0 : index
      %25 = vector.load %arg8[%c0_21, %c0_22] : memref<8x128xf32, #tpu.memory_space<vmem>>, vector<8x128xf32>
      tpu.vector_store %arg8[%c0_21, %c0_22], %24 {strides = array<i32>} : memref<8x128xf32, #tpu.memory_space<vmem>>, vector<8x128xf32>,
    } else {
    }
    %c0 = arith.constant 0 : index
    %c0_1 = arith.constant 0 : index
    %3 = vector.load %arg2[%c0, %c0_1] : memref<8x128xf32, #tpu.memory_space<vmem>>, vector<8x128xf32>
    %c0_2 = arith.constant 0 : index
    %c0_3 = arith.constant 0 : index
    %4 = vector.load %arg3[%c0_2, %c0_3] : memref<8x128xf32, #tpu.memory_space<vmem>>, vector<8x128xf32>
    %c0_4 = arith.constant 0 : index
    %c0_5 = arith.constant 0 : index
    %5 = vector.load %arg4[%c0_4, %c0_5] : memref<8x128xf32, #tpu.memory_space<vmem>>, vector<8x128xf32>
    %6 = arith.subf %3, %4 : vector<8x128xf32>
    %7 = arith.mulf %6, %6 : vector<8x128xf32>
    %8 = arith.mulf %7, %5 : vector<8x128xf32>
    %c0_6 = arith.constant 0 : index
    %c0_7 = arith.constant 0 : index
    %9 = vector.load %arg7[%c0_6, %c0_7] : memref<8x128xf32, #tpu.memory_space<vmem>>, vector<8x128xf32>
    %10 = vector.shape_cast %8 : vector<8x128xf32> to vector<1x8x128xf32>
    %cst = arith.constant dense<0.000000e+00> : vector<8x128xf32>
    %11 = vector.multi_reduction <add>, %10, %cst [0] : vector<1x8x128xf32> to vector<8x128xf32>
    %12 = arith.addf %9, %11 : vector<8x128xf32>
    %c0_8 = arith.constant 0 : index
    %c0_9 = arith.constant 0 : index
    %13 = vector.load %arg7[%c0_8, %c0_9] : memref<8x128xf32, #tpu.memory_space<vmem>>, vector<8x128xf32>
    tpu.vector_store %arg7[%c0_8, %c0_9], %12 {strides = array<i32>} : memref<8x128xf32, #tpu.memory_space<vmem>>, vector<8x128xf32>,
    %c0_10 = arith.constant 0 : index
    %c0_11 = arith.constant 0 : index
    %14 = vector.load %arg8[%c0_10, %c0_11] : memref<8x128xf32, #tpu.memory_space<vmem>>, vector<8x128xf32>
    %15 = vector.shape_cast %5 : vector<8x128xf32> to vector<1x8x128xf32>
    %cst_12 = arith.constant dense<0.000000e+00> : vector<8x128xf32>
    %16 = vector.multi_reduction <add>, %15, %cst_12 [0] : vector<1x8x128xf32> to vector<8x128xf32>
    %17 = arith.addf %14, %16 : vector<8x128xf32>
    %c0_13 = arith.constant 0 : index
    %c0_14 = arith.constant 0 : index
    %18 = vector.load %arg8[%c0_13, %c0_14] : memref<8x128xf32, #tpu.memory_space<vmem>>, vector<8x128xf32>
    tpu.vector_store %arg8[%c0_13, %c0_14], %17 {strides = array<i32>} : memref<8x128xf32, #tpu.memory_space<vmem>>, vector<8x128xf32>,
    %c0_i32_15 = arith.constant 0 : i32
    %19 = arith.cmpi eq, %arg1, %c0_i32_15 : i32
    %20 = arith.extui %19 : i1 to i32
    %c0_i32_16 = arith.constant 0 : i32
    %21 = arith.cmpi ne, %20, %c0_i32_16 : i32
    scf.if %21 {
      %c0_17 = arith.constant 0 : index
      %c0_18 = arith.constant 0 : index
      %22 = vector.load %arg7[%c0_17, %c0_18] : memref<8x128xf32, #tpu.memory_space<vmem>>, vector<8x128xf32>
      %c0_19 = arith.constant 0 : index
      %c0_20 = arith.constant 0 : index
      %c0_21 = arith.constant 0 : index
      %23 = vector.load %arg5[%c0_19, %c0_20, %c0_21] : memref<1x8x128xf32, #tpu.memory_space<vmem>>, vector<1x8x128xf32>
      %24 = vector.shape_cast %23 : vector<1x8x128xf32> to vector<8x128xf32>
      %25 = vector.shape_cast %22 : vector<8x128xf32> to vector<1x8x128xf32>
      tpu.vector_store %arg5[%c0_19, %c0_20, %c0_21], %25 {strides = array<i32>} : memref<1x8x128xf32, #tpu.memory_space<vmem>>, vector<1x8x128xf32>,
      %c0_22 = arith.constant 0 : index
      %c0_23 = arith.constant 0 : index
      %26 = vector.load %arg8[%c0_22, %c0_23] : memref<8x128xf32, #tpu.memory_space<vmem>>, vector<8x128xf32>
      %c0_24 = arith.constant 0 : index
      %c0_25 = arith.constant 0 : index
      %c0_26 = arith.constant 0 : index
      %27 = vector.load %arg6[%c0_24, %c0_25, %c0_26] : memref<1x8x128xf32, #tpu.memory_space<vmem>>, vector<1x8x128xf32>
      %28 = vector.shape_cast %27 : vector<1x8x128xf32> to vector<8x128xf32>
      %29 = vector.shape_cast %26 : vector<8x128xf32> to vector<1x8x128xf32>
      tpu.vector_store %arg6[%c0_24, %c0_25, %c0_26], %29 {strides = array<i32>} : memref<1x8x128xf32, #tpu.memory_space<vmem>>, vector<1x8x128xf32>,
    } else {
    }
    return
  }
  func.func @transform_0(%arg0: i32, %arg1: i32) -> (i32, i32) {
    %c1_i32 = arith.constant 1 : i32
    %0 = arith.muli %arg0, %c1_i32 : i32
    %1 = arith.addi %0, %arg1 : i32
    %c0_i32 = arith.constant 0 : i32
    %c0_i32_0 = arith.constant 0 : i32
    return %1, %c0_i32 : i32, i32
  }
  func.func @transform_1(%arg0: i32, %arg1: i32) -> (i32, i32) {
    %c1_i32 = arith.constant 1 : i32
    %0 = arith.muli %arg0, %c1_i32 : i32
    %1 = arith.addi %0, %arg1 : i32
    %c0_i32 = arith.constant 0 : i32
    %c0_i32_0 = arith.constant 0 : i32
    return %1, %c0_i32 : i32, i32
  }
  func.func @transform_2(%arg0: i32, %arg1: i32) -> (i32, i32) {
    %c1_i32 = arith.constant 1 : i32
    %0 = arith.muli %arg0, %c1_i32 : i32
    %1 = arith.addi %0, %arg1 : i32
    %c0_i32 = arith.constant 0 : i32
    %c0_i32_0 = arith.constant 0 : i32
    return %1, %c0_i32 : i32, i32
  }
  func.func @transform_3(%arg0: i32, %arg1: i32) -> (i32, i32, i32) {
    %c0_i32 = arith.constant 0 : i32
    %c0_i32_0 = arith.constant 0 : i32
    %c0_i32_1 = arith.constant 0 : i32
    return %arg0, %c0_i32, %c0_i32_0 : i32, i32, i32
  }
  func.func @transform_4(%arg0: i32, %arg1: i32) -> (i32, i32, i32) {
    %c0_i32 = arith.constant 0 : i32
    %c0_i32_0 = arith.constant 0 : i32
    %c0_i32_1 = arith.constant 0 : i32
    return %arg0, %c0_i32, %c0_i32_0 : i32, i32, i32
  }
}

</mosaic_0001>

<bundles_post_ra>
// kernel: masked_mse_loss.2
= control target key start
LH: loop header
LB: loop body
LE: loop exit
PB: predicated region body
PF: predicated region fallthrough
CT: control target
= control target key end

     0   :  { %v103_v2 = vlaneseq  ;;  %s238_s0 = inlined_call_operand.vmem [shape: f32[16], index: 0, kind: input, shape index: {}]   ;;  %s239_s1 = inlined_call_operand.<no memory space> [shape: f32[], index: 1, kind: input, shape index: {}]   ;;  %s240_s2 = inlined_call_operand.vmem [shape: f32[16], index: 2, kind: input, shape index: {}]   ;;  %s241_s3 = inlined_call_operand.vmem [shape: f32[16], index: 3, kind: input, shape index: {}]   ;;  %s242_s4 = inlined_call_operand.vmem [shape: f32[1,8,128], index: 4, kind: output, shape index: {0}]   ;;  %s243_s5 = inlined_call_operand.vmem [shape: f32[1,8,128], index: 5, kind: output, shape index: {1}]  }
   0x1   :  { %v11_v0 = vstv %s239_s1  ;;  %v97_v1 = vld [vmem:[%s241_s3] sm:$0x1] }
   0x2   :  { %v115_v3 = vld [vmem:[%s240_s2] sm:$0x1]  ;;  %vm106_vm0 = vcmp.lt.s32.totalorder %v103_v2, 16 }
   0x3   :  { %v133_v4 = vld [vmem:[%s238_s0] sm:$0x1]  ;;  %v107_v5 = vsel %vm106_vm0, %v97_v1, %v11_v0  ;;  %v125_v6 = vsel %vm106_vm0, %v115_v3, %v11_v0 }
   0x4   :  { %v143_v7 = vsel %vm106_vm0, %v133_v4, %v11_v0  ;;  %v155_v8 = vsub.f32 %v107_v5, %v125_v6 }
   0x5   :  { %172 = vst [vmem:[%s243_s5] sm:$0xff] %v143_v7 }
   0x6   :  { %v156_v9 = vmul.f32 %v155_v8, %v155_v8 }
   0x8   :  { %v157_v10 = vmul.f32 %v156_v9, %v143_v7 }
   0xa   :  { %170 = vst [vmem:[%s242_s4] sm:$0xff] %v157_v10 }

</bundles_post_ra>
